<compile_context>
chip_gen: v5e
topology: v5e:2x2
jax: 0.10.0
libtpu: 0.0.40
codegen_flags: <defaults>
</compile_context>

<pallas_src>
import numpy as np
import jax
import jax.numpy as jnp
from jax.experimental import pallas as pl
from jax.experimental.pallas import tpu as pltpu

# ----------------------------------------------------------------------------
# Subset construction (plain numpy; mirrors ActivityEmb.__init__ exactly).
# ----------------------------------------------------------------------------
N_BINS = 4
TOTAL_BINS = 2 * N_BINS
N_CLASSES = 2 ** TOTAL_BINS  # 256


def all_permutations_mono(n, start=0):
    vecs = []
    for i in range(start, 2 ** n):
        s = bin(i)[2:].zfill(n)
        vecs.append([float(c) for c in s])
    return np.asarray(vecs, dtype=np.float32)


def end_of_segment_mono(n, max=3):
    v = np.zeros((max + 1, n), dtype=np.float32)
    for i in range(max):
        v[i + 1, : i + 1] = 1.0
    return v


def on_activity_change_mono(n=4, min_active=2):
    base = np.zeros(n, dtype=np.float32)
    if min_active > 0:
        base[-min_active:] = 1.0
    permutable = n - min_active
    if permutable > 0:
        perms = all_permutations_mono(permutable)
        base = np.tile(base, (perms.shape[0], 1))
        base[:, :permutable] = perms
    return base


def combine_speakers(x1, x2, mirror=False):
    if x1.ndim == 1:
        x1 = x1[None]
    if x2.ndim == 1:
        x2 = x2[None]
    vad = []
    for a in x1:
        for b in x2:
            vad.append(np.stack((a, b), axis=0))
    vad = np.stack(vad)
    if mirror:
        vad = np.stack((vad, np.stack((vad[:, 1], vad[:, 0]), axis=1)))
    return vad


def onehot_to_idx(x):
    # x: (*, 2, N_BINS) binary.  Equivalent to ActivityEmb.onehot_to_idx
    # (nearest codebook vector == exact binary match; bit j has weight 2**j,
    #  flattened order = [ch0 bins..., ch1 bins...]).
    shape = x.shape
    flat = x.reshape(-1, 2 * N_BINS)
    weights = (2 ** np.arange(2 * N_BINS)).astype(np.float64)
    idx = np.round(flat.astype(np.float64) @ weights).astype(np.int64)
    return idx.reshape(shape[:-2])


def sort_idx(x):
    # matches ActivityEmb.sort_idx for the (2, K) case used here
    return np.sort(x, axis=-1)


def build_weight_matrix():
    """Build (N_CLASSES, 128) count matrix W.

    columns: 0 sil_pos_A, 1 sil_joint_A, 2 sil_pos_B, 3 sil_joint_B,
             4 act_pos_A, 5 act_joint_A, 6 act_pos_B, 7 act_joint_B,
             8 bc_A,      9 bc_B,        10 all-ones Z (softmax denominator),
             11..127 zero padding.
    """
    # --- subset_silence ---
    active = on_activity_change_mono(N_BINS, min_active=2)
    non_active = np.zeros((1, N_BINS), np.float32)
    shift_oh = combine_speakers(active, non_active, mirror=True)
    sil_shift = sort_idx(onehot_to_idx(shift_oh))          # (2, 4)
    sil_hold = sil_shift[::-1].copy()                       # flip(0)

    # --- subset_active ---
    eos = end_of_segment_mono(N_BINS, max=2)
    nav = on_activity_change_mono(N_BINS, min_active=2)
    act_shift = sort_idx(onehot_to_idx(combine_speakers(nav, eos, mirror=True)))   # (2, 12)
    zero = np.zeros((1, N_BINS), np.float32)
    act_hold = sort_idx(onehot_to_idx(combine_speakers(zero, nav, mirror=True)))   # (2, 4)

    # --- backchannel prediction subset ---
    bc_speaker = all_permutations_mono(3, start=1)
    bc_speaker = np.concatenate(
        [bc_speaker, np.zeros((bc_speaker.shape[0], 1), np.float32)], axis=-1)
    current = all_permutations_mono(3, start=0)
    current = np.concatenate(
        [current, np.ones((current.shape[0], 1), np.float32)], axis=-1)
    bc = onehot_to_idx(combine_speakers(bc_speaker, current, mirror=True))          # (2, 56)

    def cnt(idx):
        c = np.zeros(N_CLASSES, np.float32)
        np.add.at(c, np.asarray(idx).reshape(-1), 1.0)
        return c

    W = np.zeros((N_CLASSES, 128), np.float32)
    W[:, 0] = cnt(sil_shift[0])
    W[:, 1] = cnt(np.concatenate([sil_shift[0], sil_hold[0]]))
    W[:, 2] = cnt(sil_shift[1])
    W[:, 3] = cnt(np.concatenate([sil_shift[1], sil_hold[1]]))
    W[:, 4] = cnt(act_shift[0])
    W[:, 5] = cnt(np.concatenate([act_shift[0], act_hold[0]]))
    W[:, 6] = cnt(act_shift[1])
    W[:, 7] = cnt(np.concatenate([act_shift[1], act_hold[1]]))
    W[:, 8] = cnt(bc[0])
    W[:, 9] = cnt(bc[1])
    W[:, 10] = 1.0                     # Z column: sum over ALL classes
    return W


# ----------------------------------------------------------------------------
# Pallas kernel: unnormalized softmax + subset matmul + dialog-state selection.
# ----------------------------------------------------------------------------
def vap_discrete_kernel(logits_ref, va_ref, w_ref, out_ref):
    # Cast logits to f32 per-tile (input streams in native dtype, e.g. bf16).
    logits = logits_ref[...].astype(jnp.float32)               # (TM, 256)
    m = jnp.max(logits, axis=-1, keepdims=True)                # XLU reduction
    e = jnp.exp(logits - m)                                    # unnormalized softmax (EUP)

    # All subset sums (plus the Z denominator) in one MXU matmul.
    w = w_ref[...].astype(jnp.float32)                         # no-op if already f32
    sums = jnp.dot(e, w, preferred_element_type=jnp.float32)   # (TM, 128)

    # Ratios of subset sums: the softmax denominator cancels exactly.
    sil_a = sums[:, 0:1] * pl.reciprocal(sums[:, 1:2], approx=True)
    sil_b = sums[:, 2:3] * pl.reciprocal(sums[:, 3:4], approx=True)
    act_a = sums[:, 4:5] * pl.reciprocal(sums[:, 5:6], approx=True)
    act_b = sums[:, 6:7] * pl.reciprocal(sums[:, 7:8], approx=True)
    inv_z = pl.reciprocal(sums[:, 10:11], approx=True)         # 1 / sum(e)
    bc_a = sums[:, 8:9] * inv_z
    bc_b = sums[:, 9:10] * inv_z

    a = va_ref[:, 0:1]
    b = va_ref[:, 1:2]
    ds = 2.0 * b - a + 1.0      # 0: only A, 1: silence, 2: both, 3: only B
    silence = ds == 1.0
    a_cur = ds == 0.0
    b_cur = ds == 3.0
    both = ds == 2.0

    zero = jnp.zeros_like(a)
    p_a = jnp.where(silence, sil_a, zero)
    p_b = jnp.where(silence, sil_b, zero)
    p_a = jnp.where(a_cur, 1.0 - act_b, p_a)
    p_b = jnp.where(a_cur, act_b, p_b)
    p_b = jnp.where(b_cur, 1.0 - act_a, p_b)
    p_a = jnp.where(b_cur, act_a, p_a)
    inv_ovl = pl.reciprocal(act_a + act_b, approx=True)
    p_a = jnp.where(both, act_a * inv_ovl, p_a)
    p_b = jnp.where(both, act_b * inv_ovl, p_b)

    lane = jax.lax.broadcasted_iota(jnp.int32, out_ref.shape, 1)  # (TM, 4)
    out_ref[...] = jnp.where(lane == 0, p_a,
                   jnp.where(lane == 1, p_b,
                   jnp.where(lane == 2, bc_a, bc_b)))


def vap_forward(logits, va, W, *, tm=4096):
    """VAP.forward for type='discrete'.

    logits: (B, N, 256) any float dtype (bf16 recommended), va: (B, N, 2) in {0,1}.
    W: (256, 128) subset-count matrix (f32 or bf16; counts are exact either way).
    """
    B, N, C = logits.shape
    assert C == N_CLASSES
    M = B * N

    # Large row tile for HBM-roofline throughput, but clamped to the (8-aligned)
    # problem size so small problems don't over-pad and big problems keep many
    # parallel grid steps (v7x megacore sharding).
    tm_eff = int(min(tm, int(pl.cdiv(M, 8)) * 8))
    M_pad = int(pl.cdiv(M, tm_eff)) * tm_eff

    logits2 = logits.reshape(M, C)                      # keep native dtype
    va2 = va.reshape(M, 2).astype(jnp.float32)
    if M_pad != M:
        # Padded rows read as zeros -> "silence" rows with finite outputs;
        # they are sliced away below.
        logits2 = jnp.pad(logits2, ((0, M_pad - M), (0, 0)))
        va2 = jnp.pad(va2, ((0, M_pad - M), (0, 0)))

    packed = pl.pallas_call(
        vap_discrete_kernel,
        out_shape=jax.ShapeDtypeStruct((M_pad, 4), jnp.float32),
        grid=(M_pad // tm_eff,),
        in_specs=[
            pl.BlockSpec((tm_eff, C), lambda i: (i, 0)),   # logits tile (streamed)
            pl.BlockSpec((tm_eff, 2), lambda i: (i, 0)),   # va tile
            pl.BlockSpec((C, 128), lambda i: (0, 0)),      # W resident in VMEM
        ],
        out_specs=pl.BlockSpec((tm_eff, 4), lambda i: (i, 0)),
        compiler_params=pltpu.CompilerParams(
            dimension_semantics=("parallel",),
            vmem_limit_bytes=32 * 1024 * 1024),
    )(logits2, va2, W)

    packed = packed[:M].reshape(B, N, 4)
    return {"p": packed[..., 0:2], "bc_prediction": packed[..., 2:4]}


# ----------------------------------------------------------------------------
# Pure-JAX reference (same math, normalized softmax) for a correctness check.
# ----------------------------------------------------------------------------
def vap_reference(logits, va, W):
    probs = jax.nn.softmax(logits.astype(jnp.float32), axis=-1)
    sums = probs @ W
    sil_a = sums[..., 0] / sums[..., 1]
    sil_b = sums[..., 2] / sums[..., 3]
    act_a = sums[..., 4] / sums[..., 5]
    act_b = sums[..., 6] / sums[..., 7]
    bc = jnp.stack([sums[..., 8], sums[..., 9]], axis=-1)

    a = va[..., 0].astype(jnp.float32)
    b = va[..., 1].astype(jnp.float32)
    ds = 2.0 * b - a + 1.0
    silence, a_cur, b_cur, both = (ds == 1.0), (ds == 0.0), (ds == 3.0), (ds == 2.0)

    p_a = jnp.zeros_like(a)
    p_b = jnp.zeros_like(a)
    p_a = jnp.where(silence, sil_a, p_a)
    p_b = jnp.where(silence, sil_b, p_b)
    p_a = jnp.where(a_cur, 1.0 - act_b, p_a)
    p_b = jnp.where(a_cur, act_b, p_b)
    p_b = jnp.where(b_cur, 1.0 - act_a, p_b)
    p_a = jnp.where(b_cur, act_a, p_a)
    ovl = act_a + act_b
    p_a = jnp.where(both, act_a / ovl, p_a)
    p_b = jnp.where(both, act_b / ovl, p_b)
    return {"p": jnp.stack([p_a, p_b], axis=-1), "bc_prediction": bc}


if __name__ == "__main__":
    B, N, C = 2, 8, N_CLASSES
    key = jax.random.PRNGKey(0)
    k1, k2 = jax.random.split(key)
    # Native bf16 logits (kernel casts to f32 per-tile); reference consumes the
    # same bf16 values so results match up to the approx-reciprocal tolerance.
    logits = jax.random.normal(k1, (B, N, C), dtype=jnp.float32).astype(jnp.bfloat16)
    va = jax.random.bernoulli(k2, 0.5, (B, N, 2)).astype(jnp.float32)

    W_np = build_weight_matrix()
    W_f32 = jnp.asarray(W_np, dtype=jnp.float32)   # tiny (128 KiB), resident once

    out = vap_forward(logits, va, W_f32)
    jax.block_until_ready(out["p"])
    jax.block_until_ready(out["bc_prediction"])

    ref = vap_reference(logits, va, W_f32)
    # Tolerance relaxed slightly vs. exact math: kernel uses EUP approximate
    # reciprocals (pl.reciprocal(approx=True)) for all ratio outputs.
    np.testing.assert_allclose(np.asarray(out["p"]), np.asarray(ref["p"]),
                               rtol=1e-2, atol=1e-3)
    np.testing.assert_allclose(np.asarray(out["bc_prediction"]),
                               np.asarray(ref["bc_prediction"]),
                               rtol=1e-2, atol=1e-3)
    print("KERNEL_OK")
</pallas_src>

<mosaic_0001>
module attributes {stable_mosaic.version = 11 : i64} {
  func.func @vap_discrete_kernel(%arg0: i32, %arg1: memref<16x256xbf16, #tpu.memory_space<vmem>>, %arg2: memref<16x2xf32, #tpu.memory_space<vmem>>, %arg3: memref<256x128xf32, #tpu.memory_space<vmem>>, %arg4: memref<16x4xf32, #tpu.memory_space<vmem>>) attributes {dimension_semantics = [#tpu.dimension_semantics<parallel>], iteration_bounds = array<i64: 1>, scalar_prefetch = 0 : i64, scratch_operands = 0 : i64, tpu.core_type = #tpu.core_type<tc>, window_params = [{transform_indices = @transform_0, window_bounds = array<i64: 16, 256>}, {transform_indices = @transform_1, window_bounds = array<i64: 16, 2>}, {pipeline_mode = #tpu.pipeline_mode<synchronous>, transform_indices = @transform_2, window_bounds = array<i64: 256, 128>}, {transform_indices = @transform_3, window_bounds = array<i64: 16, 4>}]} {
    %c0 = arith.constant 0 : index
    %c0_0 = arith.constant 0 : index
    %0 = vector.load %arg1[%c0, %c0_0] : memref<16x256xbf16, #tpu.memory_space<vmem>>, vector<16x256xbf16>
    %1 = arith.extf %0 : vector<16x256xbf16> to vector<16x256xf32>
    %cst = arith.constant dense<0xFF800000> : vector<16xf32>
    %2 = vector.multi_reduction <maximumf>, %1, %cst [1] : vector<16x256xf32> to vector<16xf32>
    %3 = vector.shape_cast %2 : vector<16xf32> to vector<16x1xf32>
    %4 = vector.broadcast %3 : vector<16x1xf32> to vector<16x256xf32>
    %5 = arith.subf %1, %4 : vector<16x256xf32>
    %6 = math.exp %5 : vector<16x256xf32>
    %c0_1 = arith.constant 0 : index
    %c0_2 = arith.constant 0 : index
    %7 = vector.load %arg3[%c0_1, %c0_2] : memref<256x128xf32, #tpu.memory_space<vmem>>, vector<256x128xf32>
    %cst_3 = arith.constant dense<0.000000e+00> : vector<16x128xf32>
    %8 = tpu.matmul %6, %7, %cst_3 {dimension_numbers = #tpu.dot_dimension_numbers<[1], [0], [0], [1], [0, 0, 1, 1], [], []>} : vector<16x256xf32>, vector<256x128xf32>, vector<16x128xf32> -> vector<16x128xf32>
    %9 = vector.extract_strided_slice %8 {offsets = [0, 0], sizes = [16, 1], strides = [1, 1]} : vector<16x128xf32> to vector<16x1xf32>
    %10 = vector.extract_strided_slice %8 {offsets = [0, 1], sizes = [16, 1], strides = [1, 1]} : vector<16x128xf32> to vector<16x1xf32>
    %11 = tpu.reciprocal %10 {approx = true} : vector<16x1xf32> -> vector<16x1xf32>
    %12 = arith.mulf %9, %11 : vector<16x1xf32>
    %13 = vector.extract_strided_slice %8 {offsets = [0, 2], sizes = [16, 1], strides = [1, 1]} : vector<16x128xf32> to vector<16x1xf32>
    %14 = vector.extract_strided_slice %8 {offsets = [0, 3], sizes = [16, 1], strides = [1, 1]} : vector<16x128xf32> to vector<16x1xf32>
    %15 = tpu.reciprocal %14 {approx = true} : vector<16x1xf32> -> vector<16x1xf32>
    %16 = arith.mulf %13, %15 : vector<16x1xf32>
    %17 = vector.extract_strided_slice %8 {offsets = [0, 4], sizes = [16, 1], strides = [1, 1]} : vector<16x128xf32> to vector<16x1xf32>
    %18 = vector.extract_strided_slice %8 {offsets = [0, 5], sizes = [16, 1], strides = [1, 1]} : vector<16x128xf32> to vector<16x1xf32>
    %19 = tpu.reciprocal %18 {approx = true} : vector<16x1xf32> -> vector<16x1xf32>
    %20 = arith.mulf %17, %19 : vector<16x1xf32>
    %21 = vector.extract_strided_slice %8 {offsets = [0, 6], sizes = [16, 1], strides = [1, 1]} : vector<16x128xf32> to vector<16x1xf32>
    %22 = vector.extract_strided_slice %8 {offsets = [0, 7], sizes = [16, 1], strides = [1, 1]} : vector<16x128xf32> to vector<16x1xf32>
    %23 = tpu.reciprocal %22 {approx = true} : vector<16x1xf32> -> vector<16x1xf32>
    %24 = arith.mulf %21, %23 : vector<16x1xf32>
    %25 = vector.extract_strided_slice %8 {offsets = [0, 10], sizes = [16, 1], strides = [1, 1]} : vector<16x128xf32> to vector<16x1xf32>
    %26 = tpu.reciprocal %25 {approx = true} : vector<16x1xf32> -> vector<16x1xf32>
    %27 = vector.extract_strided_slice %8 {offsets = [0, 8], sizes = [16, 1], strides = [1, 1]} : vector<16x128xf32> to vector<16x1xf32>
    %28 = arith.mulf %27, %26 : vector<16x1xf32>
    %29 = vector.extract_strided_slice %8 {offsets = [0, 9], sizes = [16, 1], strides = [1, 1]} : vector<16x128xf32> to vector<16x1xf32>
    %30 = arith.mulf %29, %26 : vector<16x1xf32>
    %c0_4 = arith.constant 0 : index
    %c0_5 = arith.constant 0 : index
    %31 = vector.load %arg2[%c0_4, %c0_5] : memref<16x2xf32, #tpu.memory_space<vmem>>, vector<16x1xf32>
    %c0_6 = arith.constant 0 : index
    %c1 = arith.constant 1 : index
    %32 = vector.load %arg2[%c0_6, %c1] : memref<16x2xf32, #tpu.memory_space<vmem>>, vector<16x1xf32>
    %cst_7 = arith.constant 2.000000e+00 : f32
    %33 = vector.broadcast %cst_7 : f32 to vector<16x1xf32>
    %34 = arith.mulf %33, %32 : vector<16x1xf32>
    %35 = arith.subf %34, %31 : vector<16x1xf32>
    %cst_8 = arith.constant 1.000000e+00 : f32
    %36 = vector.broadcast %cst_8 : f32 to vector<16x1xf32>
    %37 = arith.addf %35, %36 : vector<16x1xf32>
    %cst_9 = arith.constant 1.000000e+00 : f32
    %38 = vector.broadcast %cst_9 : f32 to vector<16x1xf32>
    %39 = arith.cmpf oeq, %37, %38 : vector<16x1xf32>
    %cst_10 = arith.constant 0.000000e+00 : f32
    %40 = vector.broadcast %cst_10 : f32 to vector<16x1xf32>
    %41 = arith.cmpf oeq, %37, %40 : vector<16x1xf32>
    %cst_11 = arith.constant 3.000000e+00 : f32
    %42 = vector.broadcast %cst_11 : f32 to vector<16x1xf32>
    %43 = arith.cmpf oeq, %37, %42 : vector<16x1xf32>
    %cst_12 = arith.constant 2.000000e+00 : f32
    %44 = vector.broadcast %cst_12 : f32 to vector<16x1xf32>
    %45 = arith.cmpf oeq, %37, %44 : vector<16x1xf32>
    %cst_13 = arith.constant 0.000000e+00 : f32
    %46 = vector.broadcast %cst_13 : f32 to vector<16x1xf32>
    %47 = arith.select %39, %12, %46 : vector<16x1xi1>, vector<16x1xf32>
    %48 = arith.select %39, %16, %46 : vector<16x1xi1>, vector<16x1xf32>
    %cst_14 = arith.constant 1.000000e+00 : f32
    %49 = vector.broadcast %cst_14 : f32 to vector<16x1xf32>
    %50 = arith.subf %49, %24 : vector<16x1xf32>
    %51 = arith.select %41, %50, %47 : vector<16x1xi1>, vector<16x1xf32>
    %52 = arith.select %41, %24, %48 : vector<16x1xi1>, vector<16x1xf32>
    %cst_15 = arith.constant 1.000000e+00 : f32
    %53 = vector.broadcast %cst_15 : f32 to vector<16x1xf32>
    %54 = arith.subf %53, %20 : vector<16x1xf32>
    %55 = arith.select %43, %54, %52 : vector<16x1xi1>, vector<16x1xf32>
    %56 = arith.select %43, %20, %51 : vector<16x1xi1>, vector<16x1xf32>
    %57 = arith.addf %20, %24 : vector<16x1xf32>
    %58 = tpu.reciprocal %57 {approx = true} : vector<16x1xf32> -> vector<16x1xf32>
    %59 = arith.mulf %20, %58 : vector<16x1xf32>
    %60 = arith.select %45, %59, %56 : vector<16x1xi1>, vector<16x1xf32>
    %61 = arith.mulf %24, %58 : vector<16x1xf32>
    %62 = arith.select %45, %61, %55 : vector<16x1xi1>, vector<16x1xf32>
    %63 = tpu.iota {dimensions = array<i32: 1>} : vector<16x4xi32>
    %c0_i32 = arith.constant 0 : i32
    %64 = vector.broadcast %c0_i32 : i32 to vector<16x4xi32>
    %65 = arith.cmpi eq, %63, %64 : vector<16x4xi32>
    %c1_i32 = arith.constant 1 : i32
    %66 = vector.broadcast %c1_i32 : i32 to vector<16x4xi32>
    %67 = arith.cmpi eq, %63, %66 : vector<16x4xi32>
    %c2_i32 = arith.constant 2 : i32
    %68 = vector.broadcast %c2_i32 : i32 to vector<16x4xi32>
    %69 = arith.cmpi eq, %63, %68 : vector<16x4xi32>
    %70 = vector.shape_cast %28 : vector<16x1xf32> to vector<16x1xf32>
    %71 = vector.broadcast %70 : vector<16x1xf32> to vector<16x4xf32>
    %72 = vector.shape_cast %30 : vector<16x1xf32> to vector<16x1xf32>
    %73 = vector.broadcast %72 : vector<16x1xf32> to vector<16x4xf32>
    %74 = arith.select %69, %71, %73 : vector<16x4xi1>, vector<16x4xf32>
    %75 = vector.shape_cast %62 : vector<16x1xf32> to vector<16x1xf32>
    %76 = vector.broadcast %75 : vector<16x1xf32> to vector<16x4xf32>
    %77 = arith.select %67, %76, %74 : vector<16x4xi1>, vector<16x4xf32>
    %78 = vector.shape_cast %60 : vector<16x1xf32> to vector<16x1xf32>
    %79 = vector.broadcast %78 : vector<16x1xf32> to vector<16x4xf32>
    %80 = arith.select %65, %79, %77 : vector<16x4xi1>, vector<16x4xf32>
    %c0_16 = arith.constant 0 : index
    %c0_17 = arith.constant 0 : index
    %81 = vector.load %arg4[%c0_16, %c0_17] : memref<16x4xf32, #tpu.memory_space<vmem>>, vector<16x4xf32>
    tpu.vector_store %arg4[%c0_16, %c0_17], %80 {strides = array<i32>} : memref<16x4xf32, #tpu.memory_space<vmem>>, vector<16x4xf32>,
    return
  }
  func.func @transform_0(%arg0: i32) -> (i32, i32) {
    %c0_i32 = arith.constant 0 : i32
    %c0_i32_0 = arith.constant 0 : i32
    return %arg0, %c0_i32 : i32, i32
  }
  func.func @transform_1(%arg0: i32) -> (i32, i32) {
    %c0_i32 = arith.constant 0 : i32
    %c0_i32_0 = arith.constant 0 : i32
    return %arg0, %c0_i32 : i32, i32
  }
  func.func @transform_2(%arg0: i32) -> (i32, i32) {
    %c0_i32 = arith.constant 0 : i32
    %c0_i32_0 = arith.constant 0 : i32
    %c0_i32_1 = arith.constant 0 : i32
    return %c0_i32, %c0_i32_0 : i32, i32
  }
  func.func @transform_3(%arg0: i32) -> (i32, i32) {
    %c0_i32 = arith.constant 0 : i32
    %c0_i32_0 = arith.constant 0 : i32
    return %arg0, %c0_i32 : i32, i32
  }
}

</mosaic_0001>

<bundles_post_ra>
// kernel: tpu_custom_call.1
= control target key start
LH: loop header
LB: loop body
LE: loop exit
PB: predicated region body
PF: predicated region fallthrough
CT: control target
= control target key end

     0   :  { %8 = vsyncpa [#allocation3], 0  ;;  %s422_s15 = smov [#allocation2]   ;;  %s423_s17 = smov 128   ;;  %s540_s0 = inlined_call_operand.vmem [shape: bf16[16,256], index: 0, kind: input, shape index: {}]   ;;  %s541_s1 = inlined_call_operand.vmem [shape: f32[16,2], index: 1, kind: input, shape index: {}]   ;;  %s542_s2 = inlined_call_operand.hbm [shape: f32[256,128], index: 2, kind: input, shape index: {}]   ;;  %s543_s3 = inlined_call_operand.vmem [shape: f32[16,4], index: 3, kind: output, shape index: {}]  }
   0x1   :  { %s17_s14 = sshll.u32 %s542_s2, 4  ;;  %s19_s16 = sshll.u32 %s422_s15, 4  ;;  %s18_s14 = int_to_ptr.hbm [resolvable:$true] %s17_s14  ;;  %s20_s16 = int_to_ptr.vmem [resolvable:$true] %s19_s16 }
   0x2   :  { %s424_s18 = smov 8  }
   0x3   :  { %25 = dma.hbm_to_vmem [thread:$0]  %s18_s14, 4096, %s20_s16, [#allocation3], %s423_s17, %s423_s17, %s424_s18  }
   0x4   :  { %420 = dma.done.wait [#allocation3], 4096  }
   0x5   :  { %421 = vsyncadd [#allocation3], 4294963200  ;;  %v460_v0 = vld [vmem:[%s540_s0 + $0x8] sm:$0xff]  ;;  %v69_v1 = vld [vmem:[#allocation2 + $0x78] sm:$0xff]  ;;  %s426_s22 = smov 126   ;;  %s427_s25 = smov 1  }
   0x6   :  { %v34_v2 = vunpack.c.l.bf16 %v460_v0  ;;  %v35_v3 = vunpack.c.h.bf16 %v460_v0  ;;  %329 = vmatpush.msra.mxu2 %v69_v1  ;;  %v85_v4 = vld [vmem:[#allocation2 + $0xf8] sm:$0xff]  ;;  %v68_v5 = vld [vmem:[#allocation2 + $0x70] sm:$0xff]  ;;  %86 = vmatpush.msra.mxu0 %v69_v1  ;;  %v467_v7 = vld [vmem:[%s540_s0] sm:$0xff]  ;;  %s425_s0 = smov 127   ;;  %s428_s26 = smov 123   ;;  %vm321_vm11 = vcmask 31744  }
   0x7   :  { %v84_v6 = vld [vmem:[#allocation2 + $0xf0] sm:$0xff]  ;;  %345 = vmatpush.msra.mxu3 %v85_v4  ;;  %v67_v8 = vld [vmem:[#allocation2 + $0x68] sm:$0xff]  ;;  %109 = vmatpush.msra.mxu1 %v85_v4  ;;  %v66_v11 = vld [vmem:[#allocation2 + $0x60] sm:$0xff]  ;;  %v32_v12 = vunpack.c.l.bf16 %v467_v7  ;;  %v33_v13 = vunpack.c.h.bf16 %v467_v7  ;;  %s429_s27 = smov 125   ;;  %s430_s28 = smov 2  }
   0x8   :  { %v39_v9 = vmax.f32 %v34_v2, %v35_v3  ;;  %330 = vmatpush.msra.mxu2 %v68_v5  ;;  %v83_v10 = vld [vmem:[#allocation2 + $0xe8] sm:$0xff]  ;;  %87 = vmatpush.msra.mxu0 %v68_v5  ;;  %v82_v14 = vld [vmem:[#allocation2 + $0xe0] sm:$0xff]  ;;  %v65_v15 = vld [vmem:[#allocation2 + $0x58] sm:$0xff] }
   0x9   :  { %346 = vmatpush.msra.mxu3 %v84_v6  ;;  %110 = vmatpush.msra.mxu1 %v84_v6  ;;  %v81_v16 = vld [vmem:[#allocation2 + $0xd8] sm:$0xff]  ;;  %v64_v17 = vld [vmem:[#allocation2 + $0x50] sm:$0xff]  ;;  %v36_v18 = vmax.f32 %v32_v12, %v33_v13  ;;  %v63_v20 = vld [vmem:[#allocation2 + $0x48] sm:$0xff] }
   0xa   :  { %40 = vmax.xlane.f32.xlu0 %v39_v9  ;;  %331 = vmatpush.msra.mxu2 %v67_v8  ;;  %v80_v19 = vld [vmem:[#allocation2 + $0xd0] sm:$0xff]  ;;  %v79_v21 = vld [vmem:[#allocation2 + $0xc8] sm:$0xff]  ;;  %v62_v22 = vld [vmem:[#allocation2 + $0x40] sm:$0xff] }
   0xb   :  { %347 = vmatpush.msra.mxu3 %v83_v10  ;;  %88 = vmatpush.msra.mxu0 %v67_v8  ;;  %v78_v23 = vld [vmem:[#allocation2 + $0xc0] sm:$0xff]  ;;  %v61_v24 = vld [vmem:[#allocation2 + $0x38] sm:$0xff]  ;;  %v60_v26 = vld [vmem:[#allocation2 + $0x30] sm:$0xff] }
   0xc   :  { %332 = vmatpush.msra.mxu2 %v66_v11  ;;  %111 = vmatpush.msra.mxu1 %v83_v10  ;;  %v77_v25 = vld [vmem:[#allocation2 + $0xb8] sm:$0xff]  ;;  %v76_v27 = vld [vmem:[#allocation2 + $0xb0] sm:$0xff]  ;;  %v59_v28 = vld [vmem:[#allocation2 + $0x28] sm:$0xff] }
   0xd   :  { %348 = vmatpush.msra.mxu3 %v82_v14  ;;  %89 = vmatpush.msra.mxu0 %v66_v11  ;;  %v75_v29 = vld [vmem:[#allocation2 + $0xa8] sm:$0xff]  ;;  %v58_v30 = vld [vmem:[#allocation2 + $0x20] sm:$0xff]  ;;  %v57_v32 = vld [vmem:[#allocation2 + $0x18] sm:$0xff] }
   0xe   :  { %333 = vmatpush.msra.mxu2 %v65_v15  ;;  %112 = vmatpush.msra.mxu1 %v82_v14  ;;  %v74_v31 = vld [vmem:[#allocation2 + $0xa0] sm:$0xff]  ;;  %v73_v33 = vld [vmem:[#allocation2 + $0x98] sm:$0xff]  ;;  %v56_v34 = vld [vmem:[#allocation2 + $0x10] sm:$0xff] }
   0xf   :  { %349 = vmatpush.msra.mxu3 %v81_v16  ;;  %90 = vmatpush.msra.mxu0 %v65_v15  ;;  %v72_v35 = vld [vmem:[#allocation2 + $0x90] sm:$0xff]  ;;  %v55_v36 = vld [vmem:[#allocation2 + $0x8] sm:$0xff]  ;;  %v54_v38 = vld [vmem:[#allocation2] sm:$0xff] }
  0x10   :  { %334 = vmatpush.msra.mxu2 %v64_v17  ;;  %113 = vmatpush.msra.mxu1 %v81_v16  ;;  %v71_v37 = vld [vmem:[#allocation2 + $0x88] sm:$0xff]  ;;  %v70_v39 = vld [vmem:[#allocation2 + $0x80] sm:$0xff] }
  0x11   :  { %350 = vmatpush.msra.mxu3 %v80_v19  ;;  %91 = vmatpush.msra.mxu0 %v64_v17  ;;  %v153_v10 = vld [vmem:[%s541_s1 + $0x8] sm:$0xff] }
  0x12   :  { %37 = vmax.xlane.f32.xlu0 %v36_v18  ;;  %335 = vmatpush.msra.mxu2 %v63_v20 }
  0x13   :  { %351 = vmatpush.msra.mxu3 %v79_v21  ;;  %114 = vmatpush.msra.mxu1 %v80_v19 }
  0x14   :  { %336 = vmatpush.msra.mxu2 %v62_v22  ;;  %92 = vmatpush.msra.mxu0 %v63_v20 }
  0x15   :  { %352 = vmatpush.msra.mxu3 %v78_v23  ;;  %115 = vmatpush.msra.mxu1 %v79_v21 }
  0x16   :  { %337 = vmatpush.msra.mxu2 %v61_v24  ;;  %93 = vmatpush.msra.mxu0 %v62_v22 }
  0x17   :  { %353 = vmatpush.msra.mxu3 %v77_v25  ;;  %116 = vmatpush.msra.mxu1 %v78_v23 }
  0x18   :  { %338 = vmatpush.msra.mxu2 %v60_v26  ;;  %94 = vmatpush.msra.mxu0 %v61_v24 }
  0x19   :  { %354 = vmatpush.msra.mxu3 %v76_v27  ;;  %117 = vmatpush.msra.mxu1 %v77_v25  ;;  %v155_v25 = vmul.f32 2.0, %v153_v10 }
  0x1a   :  { %95 = vmatpush.msra.mxu0 %v60_v26  ;;  %339 = vmatpush.msra.mxu2 %v59_v28 }
  0x1b   :  { %118 = vmatpush.msra.mxu1 %v76_v27  ;;  %355 = vmatpush.msra.mxu3 %v75_v29 }
  0x1c   :  { %96 = vmatpush.msra.mxu0 %v59_v28  ;;  %340 = vmatpush.msra.mxu2 %v58_v30 }
  0x1d   :  { %119 = vmatpush.msra.mxu1 %v75_v29  ;;  %356 = vmatpush.msra.mxu3 %v74_v31 }
  0x1e   :  { %97 = vmatpush.msra.mxu0 %v58_v30  ;;  %341 = vmatpush.msra.mxu2 %v57_v32 }
  0x1f   :  { %120 = vmatpush.msra.mxu1 %v74_v31  ;;  %357 = vmatpush.msra.mxu3 %v73_v33 }
  0x20   :  { %98 = vmatpush.msra.mxu0 %v57_v32  ;;  %342 = vmatpush.msra.mxu2 %v56_v34 }
  0x21   :  { %121 = vmatpush.msra.mxu1 %v73_v33  ;;  %358 = vmatpush.msra.mxu3 %v72_v35 }
  0x22   :  { %99 = vmatpush.msra.mxu0 %v56_v34  ;;  %343 = vmatpush.msra.mxu2 %v55_v36 }
  0x23   :  { %122 = vmatpush.msra.mxu1 %v72_v35  ;;  %359 = vmatpush.msra.mxu3 %v71_v37 }
  0x24   :  { %100 = vmatpush.msra.mxu0 %v55_v36  ;;  %344 = vmatpush.msra.mxu2 %v54_v38 }
  0x25   :  { %123 = vmatpush.msra.mxu1 %v71_v37  ;;  %360 = vmatpush.msra.mxu3 %v70_v39 }
  0x26   :  { %101 = vmatpush.msra.mxu0 %v54_v38 }
  0x27   :  { %124 = vmatpush.msra.mxu1 %v70_v39  ;;  %v433_v39 = vmov 1  }
  0x7d   :  { %v41_v40 = vpop.xlane.xlu0 %40 }
  0x7e   :  { %v44_v41 = vsub.f32 %v34_v2, %v41_v40  ;;  %v45_v42 = vsub.f32 %v35_v3, %v41_v40  ;;  %v152_v2 = vld [vmem:[%s541_s1] sm:$0xff] }
  0x7f   :  { %v154_v24 = vmul.f32 2.0, %v152_v2 }
  0x80   :  { %v50_v43 = vmul.f32 1.442695, %v44_v41  ;;  %v52_v44 = vmul.f32 1.442695, %v45_v42 }
  0x82   :  { %380 = vpow2.f32 %v50_v43 }
  0x83   :  { %382 = vpow2.f32 %v52_v44 }
  0x85   :  { %v38_v45 = vpop.xlane.xlu0 %37 }
  0x86   :  { %v42_v46 = vsub.f32 %v32_v12, %v38_v45  ;;  %v43_v47 = vsub.f32 %v33_v13, %v38_v45  ;;  %v431_v12 = vmov 8   ;;  %v432_v13 = vmov 9  }
  0x87   :  { %374 = vset.pattern.permute.xlu1 %v431_v12  ;;  %373 = vset.pattern.permute.xlu0 %v431_v12 }
  0x88   :  { %v381_v48 = vpop.eup %380  ;;  %v46_v49 = vmul.f32 1.442695, %v42_v46  ;;  %v48_v50 = vmul.f32 1.442695, %v43_v47  ;;  %375 = vset.pattern.permute.xlu2 %v432_v13 }
  0x89   :  { %v383_v51 = vpop.eup %382  ;;  %105 = vmatmul.f32.vlgmr.msra.gmra.mxu2 %v381_v48 }
  0x8a   :  { %384 = vpow2.f32 %v46_v49  ;;  %128 = vmatmul.f32.vlgmr.msra.gmra.mxu3 %v383_v51 }
  0x8b   :  { %386 = vpow2.f32 %v48_v50 }
  0x90   :  { %v385_v52 = vpop.eup %384 }
  0x91   :  { %v387_v53 = vpop.eup %386  ;;  %102 = vmatmul.f32.vlgmr.msra.gmra.mxu0 %v385_v52 }
  0x92   :  { %125 = vmatmul.f32.vlgmr.msra.gmra.mxu1 %v387_v53 }
 0x10c   :  { %v106_v57 = vpop.f32.mrf.mxu2 }
 0x10d   :  { %v129_v58 = vpop.f32.mrf.mxu3 }
 0x10e   :  { %v103_v54 = vpop.f32.mrf.mxu0  ;;  %v130_v59 = vadd.f32 %v129_v58, %v106_v57 }
 0x10f   :  { %v126_v55 = vpop.f32.mrf.mxu1 }
 0x110   :  { %v487_v56 = vadd.f32 %v126_v55, %v103_v54 }
 0x112   :  { %388 = vrcp.f32 %v487_v56 }
 0x113   :  { %390 = vrcp.f32 %v130_v59 }
 0x118   :  { %v389_v60 = vpop.eup %388 }
 0x119   :  { %136 = vrot.lane.b32.xlu1 %v389_v60, %s425_s0  ;;  %v391_v61 = vpop.eup %390 }
 0x121   :  { %138 = vrot.lane.b32.xlu1 %v391_v61, %s425_s0 }
 0x129   :  { %146 = vrot.lane.b32.xlu1 %v391_v61, %s426_s22 }
 0x18b   :  { %v137_v62 = vpop.permute.xlu1 %136 }
 0x18c   :  { %v493_v63 = vmul.f32 %v137_v62, %v487_v56 }
 0x18e   :  { %230 = vrot.lane.b32.xlu2 %v493_v63, %s426_s22  ;;  %v194_v11 = vsub.f32 1.0, %v493_v63 }
 0x193   :  { %v139_v0 = vpop.permute.xlu1 %138 }
 0x194   :  { %v143_v1 = vmul.f32 %v139_v0, %v130_v59 }
 0x196   :  { %232 = vrot.lane.b32.xlu2 %v143_v1, %s426_s22  ;;  %v195_v3 = vsub.f32 1.0, %v143_v1 }
 0x19b   :  { %v147_v15 = vpop.permute.xlu1 %146 }
 0x19c   :  { %v151_v16 = vmul.f32 %v147_v15, %v130_v59 }
 0x19e   :  { %144 = vrot.lane.b32.xlu2 %v389_v60, %s426_s22 }
 0x1a6   :  { %158 = vrot.lane.b32.xlu2 %v152_v2, %s427_s25  ;;  %v272_v2 = vlaneseq }
 0x1ae   :  { %178 = vrot.lane.b32.xlu2 %v493_v63, %s427_s25 }
 0x1b6   :  { %188 = vrot.lane.b32.xlu2 %v143_v1, %s425_s0 }
 0x1be   :  { %208 = vrot.lane.b32.xlu2 %v143_v1, %s428_s26 }
 0x1c6   :  { %216 = vrot.lane.b32.xlu2 %v195_v3, %s429_s27 }
 0x1e8   :  { %v231_v4 = vpop.permute.xlu2 %230 }
 0x1e9   :  { %v236_v5 = vadd.f32 %v231_v4, %v493_v63 }
 0x1eb   :  { %392 = vrcp.f32 %v236_v5  ;;  %v273_v5 = vand.u32 127, %v272_v2 }
 0x1ed   :  { %vm275_vm8 = vcmp.eq.s32.totalorder %v273_v5, 1  ;;  %vm276_vm9 = vcmp.eq.s32.totalorder %v273_v5, 2  ;;  %vm274_vm10 = vcmp.eq.s32.totalorder %v273_v5, 0 }
 0x1f0   :  { %v233_v6 = vpop.permute.xlu2 %232 }
 0x1f1   :  { %v393_v7 = vpop.eup %392  ;;  %v237_v8 = vadd.f32 %v233_v6, %v143_v1 }
 0x1f2   :  { %254 = vrot.lane.b32.xlu0 %v393_v7, %s430_s28  ;;  %v240_v14 = vmul.f32 %v393_v7, %v493_v63 }
 0x1f3   :  { %394 = vrcp.f32 %v237_v8 }
 0x1f8   :  { %v145_v19 = vpop.permute.xlu2 %144 }
 0x1f9   :  { %v395_v9 = vpop.eup %394  ;;  %v150_v30 = vmul.f32 %v145_v19, %v487_v56 }
 0x1fa   :  { %180 = vrot.lane.b32.xlu0 %v143_v1, %s427_s25  ;;  %256 = vrot.lane.b32.xlu1 %v395_v9, %s430_s28  ;;  %v241_v23 = vmul.f32 %v395_v9, %v143_v1 }
 0x200   :  { %v159_v26 = vpop.permute.xlu2 %158 }
 0x201   :  { %v164_v27 = vsub.f32 %v154_v24, %v159_v26 }
 0x202   :  { %198 = vrot.lane.b32.xlu0 %v194_v11, %s428_s26  ;;  %160 = vrot.lane.b32.xlu1 %v153_v10, %s427_s25 }
 0x203   :  { %v166_v33 = vadd.f32 1.0, %v164_v27 }
 0x205   :  { %vm168_vm1 = vcmp.eq.f32.partialorder %v166_v33, 1.0  ;;  %vm170_vm3 = vcmp.eq.f32.partialorder %v166_v33, 0.0  ;;  %vm172_vm4 = vcmp.eq.f32.partialorder %v166_v33, 3.0  ;;  %vm174_vm6 = vcmp.eq.f32.partialorder %v166_v33, 2.0 }
 0x208   :  { %v179_v46 = vpop.permute.xlu2 %178 }
 0x209   :  { %v184_v48 = vsel %vm168_vm1, %v179_v46, 0.0 }
 0x20a   :  { %186 = vrot.lane.b32.xlu1 %v493_v63, %s425_s0  ;;  %200 = vrot.lane.b32.xlu0 %v195_v3, %s428_s26 }
 0x210   :  { %v189_v53 = vpop.permute.xlu2 %188 }
 0x212   :  { %206 = vrot.lane.b32.xlu1 %v493_v63, %s428_s26  ;;  %222 = vrot.lane.b32.xlu0 %v493_v63, %s429_s27 }
 0x218   :  { %v209_v54 = vpop.permute.xlu2 %208 }
 0x21a   :  { %214 = vrot.lane.b32.xlu1 %v194_v11, %s429_s27 }
 0x220   :  { %v217_v55 = vpop.permute.xlu2 %216 }
 0x222   :  { %224 = vrot.lane.b32.xlu1 %v143_v1, %s429_s27 }
 0x22a   :  { %244 = vrot.lane.b32.xlu1 %v240_v14, %s429_s27 }
 0x232   :  { %284 = vperm.xlu1 %374, %v151_v16  }
 0x23a   :  { %376 = vset.pattern.permute.xlu1 %v432_v13 }
 0x23b   :  { %292 = vperm.xlu1 %376, %v143_v1  }
 0x243   :  { %379 = vset.pattern.permute.xlu1 %v433_v39 }
 0x264   :  { %v255_v17 = vpop.permute.xlu0 %254 }
 0x265   :  { %v260_v18 = vmul.f32 %v255_v17, %v493_v63 }
 0x267   :  { %264 = vrot.lane.b32.xlu2 %v260_v18, %s428_s26 }
 0x26c   :  { %v181_v20 = vpop.permute.xlu0 %180  ;;  %v257_v21 = vpop.permute.xlu1 %256 }
 0x26d   :  { %v261_v22 = vmul.f32 %v257_v21, %v143_v1 }
 0x26f   :  { %246 = vrot.lane.b32.xlu2 %v241_v23, %s429_s27  ;;  %266 = vrot.lane.b32.xlu0 %v261_v22, %s428_s26 }
 0x274   :  { %v199_v28 = vpop.permute.xlu0 %198  ;;  %v161_v29 = vpop.permute.xlu1 %160 }
 0x275   :  { %v165_v31 = vsub.f32 %v155_v25, %v161_v29  ;;  %v204_v49 = vsel %vm170_vm3, %v199_v28, %v184_v48 }
 0x277   :  { %v167_v32 = vadd.f32 1.0, %v165_v31  ;;  %288 = vperm.xlu2 %375, %v493_v63   ;;  %279 = vperm.xlu0 %373, %v150_v30  }
 0x279   :  { %vm169_vm0 = vcmp.eq.f32.partialorder %v167_v32, 1.0  ;;  %vm171_vm2 = vcmp.eq.f32.partialorder %v167_v32, 0.0  ;;  %vm173_vm5 = vcmp.eq.f32.partialorder %v167_v32, 3.0  ;;  %vm175_vm7 = vcmp.eq.f32.partialorder %v167_v32, 2.0 }
 0x27a   :  { %v185_v34 = vsel %vm169_vm0, %v181_v20, 0.0  ;;  %v193_v60 = vsel %vm169_vm0, %v189_v53, 0.0 }
 0x27b   :  { %v213_v61 = vsel %vm171_vm2, %v209_v54, %v193_v60 }
 0x27c   :  { %v201_v35 = vpop.permute.xlu0 %200  ;;  %v187_v36 = vpop.permute.xlu1 %186  ;;  %v221_v63 = vsel %vm173_vm5, %v217_v55, %v213_v61 }
 0x27d   :  { %v205_v37 = vsel %vm171_vm2, %v201_v35, %v185_v34  ;;  %v192_v38 = vsel %vm168_vm1, %v187_v36, 0.0 }
 0x27f   :  { %377 = vset.pattern.permute.xlu2 %v433_v39  ;;  %378 = vset.pattern.permute.xlu0 %v433_v39 }
 0x284   :  { %v207_v40 = vpop.permute.xlu1 %206  ;;  %v223_v47 = vpop.permute.xlu0 %222 }
 0x285   :  { %v212_v41 = vsel %vm170_vm3, %v207_v40, %v192_v38  ;;  %v228_v50 = vsel %vm172_vm4, %v223_v47, %v204_v49 }
 0x28c   :  { %v215_v42 = vpop.permute.xlu1 %214 }
 0x28d   :  { %v220_v43 = vsel %vm172_vm4, %v215_v42, %v212_v41 }
 0x294   :  { %v225_v44 = vpop.permute.xlu1 %224 }
 0x295   :  { %v229_v45 = vsel %vm173_vm5, %v225_v44, %v205_v37 }
 0x29c   :  { %v245_v51 = vpop.permute.xlu1 %244 }
 0x29d   :  { %v250_v52 = vsel %vm174_vm6, %v245_v51, %v228_v50 }
 0x29e   :  { %311 = vperm.xlu1 %379, %v250_v52  }
 0x2a4   :  { %v285_v1 = vpop.permute.xlu1 %284 }
 0x2ad   :  { %v293_v4 = vpop.permute.xlu1 %292 }
 0x2ae   :  { %v296_v12 = vsel %vm276_vm9, %v285_v1, %v293_v4 }
 0x2c1   :  { %v265_v56 = vpop.permute.xlu2 %264 }
 0x2c2   :  { %v270_v57 = vsel %vm174_vm6, %v265_v56, %v220_v43 }
 0x2c3   :  { %299 = vperm.xlu2 %377, %v270_v57  }
 0x2c9   :  { %v247_v58 = vpop.permute.xlu2 %246 }
 0x2ca   :  { %v251_v59 = vsel %vm175_vm7, %v247_v58, %v229_v45 }
 0x2cb   :  { %316 = vperm.xlu2 %377, %v251_v59  }
 0x2d1   :  { %v289_v3 = vpop.permute.xlu2 %288 }
 0x2e1   :  { %v267_v62 = vpop.permute.xlu0 %266 }
 0x2e2   :  { %v271_v0 = vsel %vm175_vm7, %v267_v62, %v221_v63 }
 0x2e3   :  { %304 = vperm.xlu0 %378, %v271_v0  }
 0x2e9   :  { %v280_v6 = vpop.permute.xlu0 %279 }
 0x2ea   :  { %v295_v7 = vsel %vm276_vm9, %v280_v6, %v289_v3 }
 0x310   :  { %v312_v9 = vpop.permute.xlu1 %311 }
 0x31d   :  { %v300_v8 = vpop.permute.xlu2 %299 }
 0x31e   :  { %v307_v10 = vsel %vm275_vm8, %v300_v8, %v295_v7 }
 0x31f   :  { %v319_v11 = vsel %vm274_vm10, %v312_v9, %v307_v10 }
 0x320   :  { %322 = vst.msk [vmem:[%s543_s3] sm:$0xff] %vm321_vm11, %v319_v11 }
 0x325   :  { %v317_v14 = vpop.permute.xlu2 %316 }
 0x355   :  { %v305_v13 = vpop.permute.xlu0 %304 }
 0x356   :  { %v308_v15 = vsel %vm275_vm8, %v305_v13, %v296_v12 }
 0x357   :  { %v320_v16 = vsel %vm274_vm10, %v317_v14, %v308_v15 }
 0x358   :  { %323 = vst.msk [vmem:[%s543_s3 + $0x8] sm:$0xff] %vm321_vm11, %v320_v16 }
 0x359   :  { %328 = vsyncpa [#allocation3], 1 }

</bundles_post_ra>
